<compile_context>
chip_gen: v6e
topology: v6e:2x2x1
jax: 0.10.0
libtpu: 0.0.40
codegen_flags: <defaults>
</compile_context>

<pallas_src>
import jax
import jax.numpy as jnp
from jax.experimental import pallas as pl
from jax.experimental.pallas import tpu as pltpu


NEG_INF = -1e30  # bias for padded logit columns; exp(NEG_INF - m) == 0 in f32


def _round_up(n, m):
    return (n + m - 1) // m * m


# ----------------------------------------------------------------------------
# Kernel
# ----------------------------------------------------------------------------
def policy_net_kernel(x_ref, w1_ref, b1_ref, w2_ref, b2_ref, w3_ref, b3_ref,
                      o_ref):
    # x tile arrives f32; cast to bf16 in-kernel so the wrapper needs no
    # separate conversion pass over the activations.
    x = x_ref[...].astype(jnp.bfloat16)

    # Linear(E, Hp) + ReLU   (bf16 MXU, f32 accumulate; bias/ReLU in f32)
    h1 = jnp.dot(x, w1_ref[...], preferred_element_type=jnp.float32) + b1_ref[...]
    h1 = jnp.maximum(h1, 0.0)

    # Linear(Hp, Ap) + ReLU
    h2 = jnp.dot(h1.astype(w2_ref.dtype), w2_ref[...],
                 preferred_element_type=jnp.float32) + b2_ref[...]
    h2 = jnp.maximum(h2, 0.0)

    # Linear(Ap, Ap)  -- padded columns have zero weights and -1e30 bias.
    h3 = jnp.dot(h2.astype(w3_ref.dtype), w3_ref[...],
                 preferred_element_type=jnp.float32) + b3_ref[...]

    # log_softmax over the padded action axis in f32.  Padded columns
    # contribute exp(-1e30 - m) == 0, so the normalization is exact.
    m = jnp.max(h3, axis=-1, keepdims=True)
    shifted = h3 - m
    lse = jnp.log(jnp.sum(jnp.exp(shifted), axis=-1, keepdims=True))
    log_pi = shifted - lse

    # Store only the real action columns (unpadded output cuts HBM writeback).
    a = o_ref.shape[-1]
    o_ref[...] = log_pi[:, :a].astype(o_ref.dtype)


# ----------------------------------------------------------------------------
# One-time parameter preparation (do NOT call per step)
# ----------------------------------------------------------------------------
def prepare_params(params):
    """Convert the f32 (in, out) Linear params to the padded bf16 layout
    consumed by the kernel.  Call once at init and cache the result."""
    w1, b1, w2, b2, w3, b3 = params
    E, H = w1.shape
    A = w3.shape[1]
    Hp = _round_up(max(H, 128), 128)
    Ap = _round_up(max(A, 128), 128)

    w1p = jnp.pad(w1, ((0, 0), (0, Hp - H))).astype(jnp.bfloat16)
    b1p = jnp.pad(b1, ((0, 0), (0, Hp - H)))                       # f32
    w2p = jnp.pad(w2, ((0, Hp - H), (0, Ap - A))).astype(jnp.bfloat16)
    b2p = jnp.pad(b2, ((0, 0), (0, Ap - A)))                       # f32
    w3p = jnp.pad(w3, ((0, Ap - A), (0, Ap - A))).astype(jnp.bfloat16)
    b3p = jnp.pad(b3, ((0, 0), (0, Ap - A)), constant_values=NEG_INF)  # f32
    return (w1p, b1p, w2p, b2p, w3p, b3p, A)


# ----------------------------------------------------------------------------
# Forward wrapper
# ----------------------------------------------------------------------------
def policy_network_forward(x, prepared, *, block_b=4096):
    """x: (B, embedded_size) float32.  Returns log_pi: (B, action_space) f32."""
    w1b, b1, w2b, b2, w3b, b3, A = prepared
    B, E = x.shape
    Hp = w1b.shape[1]
    Ap = w3b.shape[1]

    # Batch tile: as large as allowed (the kernel is mem/step-overhead bound),
    # multiple of 16, but capped at ceil(B/2) so the grid has >= 2 steps when
    # B permits (lets the "parallel" axis use both TCs on v7x).
    bm = min(_round_up(block_b, 16),
             _round_up(pl.cdiv(B, 2), 16),
             _round_up(B, 8))
    bm = max(bm, 8)
    grid = (pl.cdiv(B, bm),)

    def resident(a):
        # Full-array block, same block every grid step -> stays in VMEM.
        return pl.BlockSpec(a.shape, lambda i: (0,) * a.ndim)

    cost = pl.CostEstimate(
        flops=2 * B * (E * Hp + Hp * Ap + Ap * Ap),
        transcendentals=B * (Ap + 1),
        bytes_accessed=(x.size * x.dtype.itemsize
                        + B * A * 4
                        + sum(int(w.size) * w.dtype.itemsize
                              for w in (w1b, b1, w2b, b2, w3b, b3))),
    )

    return pl.pallas_call(
        policy_net_kernel,
        out_shape=jax.ShapeDtypeStruct((B, A), jnp.float32),
        grid=grid,
        in_specs=[
            pl.BlockSpec((bm, E), lambda i: (i, 0)),   # x: tiled over batch
            resident(w1b), resident(b1),
            resident(w2b), resident(b2),
            resident(w3b), resident(b3),
        ],
        out_specs=pl.BlockSpec((bm, A), lambda i: (i, 0)),
        compiler_params=pltpu.CompilerParams(
            dimension_semantics=("parallel",)),
        cost_estimate=cost,
    )(x, w1b, b1, w2b, b2, w3b, b3)


# ----------------------------------------------------------------------------
# Parameters & references
# ----------------------------------------------------------------------------
def init_params(key, embedded_size, action_space):
    """Deterministic synthetic parameters (shapes match the nn.Linear layers)."""
    ks = jax.random.split(key, 6)
    hidden = 2 * embedded_size

    def lin(kw, kb, fan_in, fan_out):
        bound = 1.0 / jnp.sqrt(fan_in)
        # stored as (in, out) — transpose of PyTorch's (out, in)
        w = jax.random.uniform(kw, (fan_in, fan_out), jnp.float32, -bound, bound)
        b = jax.random.uniform(kb, (1, fan_out), jnp.float32, -bound, bound)
        return w, b

    w1, b1 = lin(ks[0], ks[1], embedded_size, hidden)
    w2, b2 = lin(ks[2], ks[3], hidden, action_space)
    w3, b3 = lin(ks[4], ks[5], action_space, action_space)
    return (w1, b1, w2, b2, w3, b3)


def reference_forward_bf16(x, params):
    """Reference matching the kernel's mixed precision (bf16 dots, f32 rest)."""
    w1, b1, w2, b2, w3, b3 = params
    h = jnp.dot(x.astype(jnp.bfloat16), w1.astype(jnp.bfloat16),
                preferred_element_type=jnp.float32) + b1
    h = jnp.maximum(h, 0.0)
    h = jnp.dot(h.astype(jnp.bfloat16), w2.astype(jnp.bfloat16),
                preferred_element_type=jnp.float32) + b2
    h = jnp.maximum(h, 0.0)
    h = jnp.dot(h.astype(jnp.bfloat16), w3.astype(jnp.bfloat16),
                preferred_element_type=jnp.float32) + b3
    return jax.nn.log_softmax(h, axis=1)


def reference_forward_f32(x, params):
    w1, b1, w2, b2, w3, b3 = params
    h = jnp.maximum(x @ w1 + b1, 0.0)
    h = jnp.maximum(h @ w2 + b2, 0.0)
    h = h @ w3 + b3
    return jax.nn.log_softmax(h, axis=1)


if __name__ == "__main__":
    # Small shapes consistent with the module's forward.
    batch = 8
    embedded_size = 32
    action_space = 16

    key = jax.random.PRNGKey(0)
    kx, kp, kx2 = jax.random.split(key, 3)

    x = jax.random.normal(kx, (batch, embedded_size), dtype=jnp.float32)
    params = init_params(kp, embedded_size, action_space)
    prepared = prepare_params(params)            # one-time weight prep (cached)

    log_pi = policy_network_forward(x, prepared)
    log_pi = jax.block_until_ready(log_pi)
    assert log_pi.shape == (batch, action_space)

    ref_bf = reference_forward_bf16(x, params)
    ref_f32 = reference_forward_f32(x, params)
    assert jnp.allclose(log_pi, ref_bf, atol=2e-3, rtol=2e-3), \
        "mismatch vs bf16-matched reference"
    assert jnp.allclose(log_pi, ref_f32, atol=5e-2, rtol=5e-2), \
        "mismatch vs f32 reference"

    # Second check: non-multiple batch -> real grid with a masked partial
    # last block (exercises pipelining + edge masking, no explicit padding).
    batch2 = 300
    x2 = jax.random.normal(kx2, (batch2, embedded_size), dtype=jnp.float32)
    log_pi2 = policy_network_forward(x2, prepared, block_b=128)
    log_pi2 = jax.block_until_ready(log_pi2)
    assert log_pi2.shape == (batch2, action_space)
    ref2 = reference_forward_bf16(x2, params)
    assert jnp.allclose(log_pi2, ref2, atol=2e-3, rtol=2e-3), \
        "mismatch vs reference (gridded / partial-block case)"
    assert bool(jnp.all(jnp.isfinite(log_pi2))), "non-finite values in output"

    print("KERNEL_OK")
</pallas_src>

<mosaic_0001>
module attributes {stable_mosaic.version = 11 : i64} {
  func.func @policy_net_kernel(%arg0: i32, %arg1: memref<8x32xf32, #tpu.memory_space<vmem>>, %arg2: memref<32x128xbf16, #tpu.memory_space<vmem>>, %arg3: memref<1x128xf32, #tpu.memory_space<vmem>>, %arg4: memref<128x128xbf16, #tpu.memory_space<vmem>>, %arg5: memref<1x128xf32, #tpu.memory_space<vmem>>, %arg6: memref<128x128xbf16, #tpu.memory_space<vmem>>, %arg7: memref<1x128xf32, #tpu.memory_space<vmem>>, %arg8: memref<8x16xf32, #tpu.memory_space<vmem>>) attributes {dimension_semantics = [#tpu.dimension_semantics<parallel>], iteration_bounds = array<i64: 1>, scalar_prefetch = 0 : i64, scratch_operands = 0 : i64, tpu.core_type = #tpu.core_type<tc>, window_params = [{transform_indices = @transform_0, window_bounds = array<i64: 8, 32>}, {pipeline_mode = #tpu.pipeline_mode<synchronous>, transform_indices = @transform_1, window_bounds = array<i64: 32, 128>}, {pipeline_mode = #tpu.pipeline_mode<synchronous>, transform_indices = @transform_2, window_bounds = array<i64: 1, 128>}, {pipeline_mode = #tpu.pipeline_mode<synchronous>, transform_indices = @transform_3, window_bounds = array<i64: 128, 128>}, {pipeline_mode = #tpu.pipeline_mode<synchronous>, transform_indices = @transform_4, window_bounds = array<i64: 1, 128>}, {pipeline_mode = #tpu.pipeline_mode<synchronous>, transform_indices = @transform_5, window_bounds = array<i64: 128, 128>}, {pipeline_mode = #tpu.pipeline_mode<synchronous>, transform_indices = @transform_6, window_bounds = array<i64: 1, 128>}, {transform_indices = @transform_7, window_bounds = array<i64: 8, 16>}]} {
    %c0 = arith.constant 0 : index
    %c0_0 = arith.constant 0 : index
    %0 = vector.load %arg1[%c0, %c0_0] : memref<8x32xf32, #tpu.memory_space<vmem>>, vector<8x32xf32>
    %1 = arith.truncf %0 : vector<8x32xf32> to vector<8x32xbf16>
    %c0_1 = arith.constant 0 : index
    %c0_2 = arith.constant 0 : index
    %2 = vector.load %arg2[%c0_1, %c0_2] : memref<32x128xbf16, #tpu.memory_space<vmem>>, vector<32x128xbf16>
    %cst = arith.constant dense<0.000000e+00> : vector<8x128xf32>
    %3 = tpu.matmul %1, %2, %cst {dimension_numbers = #tpu.dot_dimension_numbers<[1], [0], [0], [1], [0, 0, 1, 1], [], []>} : vector<8x32xbf16>, vector<32x128xbf16>, vector<8x128xf32> -> vector<8x128xf32>
    %c0_3 = arith.constant 0 : index
    %c0_4 = arith.constant 0 : index
    %4 = vector.load %arg3[%c0_3, %c0_4] : memref<1x128xf32, #tpu.memory_space<vmem>>, vector<1x128xf32>
    %5 = vector.broadcast %4 : vector<1x128xf32> to vector<8x128xf32>
    %6 = arith.addf %3, %5 : vector<8x128xf32>
    %cst_5 = arith.constant 0.000000e+00 : f32
    %7 = vector.broadcast %cst_5 : f32 to vector<8x128xf32>
    %8 = arith.maximumf %6, %7 : vector<8x128xf32>
    %9 = arith.truncf %8 : vector<8x128xf32> to vector<8x128xbf16>
    %c0_6 = arith.constant 0 : index
    %c0_7 = arith.constant 0 : index
    %10 = vector.load %arg4[%c0_6, %c0_7] : memref<128x128xbf16, #tpu.memory_space<vmem>>, vector<128x128xbf16>
    %cst_8 = arith.constant dense<0.000000e+00> : vector<8x128xf32>
    %11 = tpu.matmul %9, %10, %cst_8 {dimension_numbers = #tpu.dot_dimension_numbers<[1], [0], [0], [1], [0, 0, 1, 1], [], []>} : vector<8x128xbf16>, vector<128x128xbf16>, vector<8x128xf32> -> vector<8x128xf32>
    %c0_9 = arith.constant 0 : index
    %c0_10 = arith.constant 0 : index
    %12 = vector.load %arg5[%c0_9, %c0_10] : memref<1x128xf32, #tpu.memory_space<vmem>>, vector<1x128xf32>
    %13 = vector.broadcast %12 : vector<1x128xf32> to vector<8x128xf32>
    %14 = arith.addf %11, %13 : vector<8x128xf32>
    %cst_11 = arith.constant 0.000000e+00 : f32
    %15 = vector.broadcast %cst_11 : f32 to vector<8x128xf32>
    %16 = arith.maximumf %14, %15 : vector<8x128xf32>
    %17 = arith.truncf %16 : vector<8x128xf32> to vector<8x128xbf16>
    %c0_12 = arith.constant 0 : index
    %c0_13 = arith.constant 0 : index
    %18 = vector.load %arg6[%c0_12, %c0_13] : memref<128x128xbf16, #tpu.memory_space<vmem>>, vector<128x128xbf16>
    %cst_14 = arith.constant dense<0.000000e+00> : vector<8x128xf32>
    %19 = tpu.matmul %17, %18, %cst_14 {dimension_numbers = #tpu.dot_dimension_numbers<[1], [0], [0], [1], [0, 0, 1, 1], [], []>} : vector<8x128xbf16>, vector<128x128xbf16>, vector<8x128xf32> -> vector<8x128xf32>
    %c0_15 = arith.constant 0 : index
    %c0_16 = arith.constant 0 : index
    %20 = vector.load %arg7[%c0_15, %c0_16] : memref<1x128xf32, #tpu.memory_space<vmem>>, vector<1x128xf32>
    %21 = vector.broadcast %20 : vector<1x128xf32> to vector<8x128xf32>
    %22 = arith.addf %19, %21 : vector<8x128xf32>
    %cst_17 = arith.constant dense<0xFF800000> : vector<8xf32>
    %23 = vector.multi_reduction <maximumf>, %22, %cst_17 [1] : vector<8x128xf32> to vector<8xf32>
    %24 = vector.shape_cast %23 : vector<8xf32> to vector<8x1xf32>
    %25 = vector.broadcast %24 : vector<8x1xf32> to vector<8x128xf32>
    %26 = arith.subf %22, %25 : vector<8x128xf32>
    %27 = math.exp %26 : vector<8x128xf32>
    %cst_18 = arith.constant dense<0.000000e+00> : vector<8xf32>
    %28 = vector.multi_reduction <add>, %27, %cst_18 [1] : vector<8x128xf32> to vector<8xf32>
    %29 = vector.shape_cast %28 : vector<8xf32> to vector<8x1xf32>
    %30 = math.log %29 : vector<8x1xf32>
    %31 = vector.broadcast %30 : vector<8x1xf32> to vector<8x128xf32>
    %32 = arith.subf %26, %31 : vector<8x128xf32>
    %33 = vector.extract_strided_slice %32 {offsets = [0, 0], sizes = [8, 16], strides = [1, 1]} : vector<8x128xf32> to vector<8x16xf32>
    %c0_19 = arith.constant 0 : index
    %c0_20 = arith.constant 0 : index
    %34 = vector.load %arg8[%c0_19, %c0_20] : memref<8x16xf32, #tpu.memory_space<vmem>>, vector<8x16xf32>
    tpu.vector_store %arg8[%c0_19, %c0_20], %33 {strides = array<i32>} : memref<8x16xf32, #tpu.memory_space<vmem>>, vector<8x16xf32>,
    return
  }
  func.func @transform_0(%arg0: i32) -> (i32, i32) {
    %c0_i32 = arith.constant 0 : i32
    %c0_i32_0 = arith.constant 0 : i32
    return %arg0, %c0_i32 : i32, i32
  }
  func.func @transform_1(%arg0: i32) -> (i32, i32) {
    %c0_i32 = arith.constant 0 : i32
    %c0_i32_0 = arith.constant 0 : i32
    %c0_i32_1 = arith.constant 0 : i32
    return %c0_i32, %c0_i32_0 : i32, i32
  }
  func.func @transform_2(%arg0: i32) -> (i32, i32) {
    %c0_i32 = arith.constant 0 : i32
    %c0_i32_0 = arith.constant 0 : i32
    %c0_i32_1 = arith.constant 0 : i32
    return %c0_i32, %c0_i32_0 : i32, i32
  }
  func.func @transform_3(%arg0: i32) -> (i32, i32) {
    %c0_i32 = arith.constant 0 : i32
    %c0_i32_0 = arith.constant 0 : i32
    %c0_i32_1 = arith.constant 0 : i32
    return %c0_i32, %c0_i32_0 : i32, i32
  }
  func.func @transform_4(%arg0: i32) -> (i32, i32) {
    %c0_i32 = arith.constant 0 : i32
    %c0_i32_0 = arith.constant 0 : i32
    %c0_i32_1 = arith.constant 0 : i32
    return %c0_i32, %c0_i32_0 : i32, i32
  }
  func.func @transform_5(%arg0: i32) -> (i32, i32) {
    %c0_i32 = arith.constant 0 : i32
    %c0_i32_0 = arith.constant 0 : i32
    %c0_i32_1 = arith.constant 0 : i32
    return %c0_i32, %c0_i32_0 : i32, i32
  }
  func.func @transform_6(%arg0: i32) -> (i32, i32) {
    %c0_i32 = arith.constant 0 : i32
    %c0_i32_0 = arith.constant 0 : i32
    %c0_i32_1 = arith.constant 0 : i32
    return %c0_i32, %c0_i32_0 : i32, i32
  }
  func.func @transform_7(%arg0: i32) -> (i32, i32) {
    %c0_i32 = arith.constant 0 : i32
    %c0_i32_0 = arith.constant 0 : i32
    return %arg0, %c0_i32 : i32, i32
  }
}

</mosaic_0001>

<bundles_post_ra>
// kernel: tpu_custom_call.1
= control target key start
LH: loop header
LB: loop body
LE: loop exit
PB: predicated region body
PF: predicated region fallthrough
CT: control target
= control target key end

     0   :  { %12 = vsyncpa [#allocation3], 0  ;;  %s741_s0 = inlined_call_operand.hbm [shape: f32[8,32], index: 0, kind: input, shape index: {}]   ;;  %s742_s1 = inlined_call_operand.hbm [shape: bf16[32,128], index: 1, kind: input, shape index: {}]   ;;  %s743_s2 = inlined_call_operand.vmem [shape: f32[1,128], index: 2, kind: input, shape index: {}]   ;;  %s744_s3 = inlined_call_operand.hbm [shape: bf16[128,128], index: 3, kind: input, shape index: {}]   ;;  %s745_s4 = inlined_call_operand.vmem [shape: f32[1,128], index: 4, kind: input, shape index: {}]   ;;  %s746_s5 = inlined_call_operand.hbm [shape: bf16[128,128], index: 5, kind: input, shape index: {}]   ;;  %s747_s6 = inlined_call_operand.vmem [shape: f32[1,128], index: 6, kind: input, shape index: {}]   ;;  %s748_s7 = inlined_call_operand.hbm [shape: f32[8,16], index: 7, kind: output, shape index: {}]  }
   0x1   :  { %13 = vsyncpa [#allocation6], 0 }
   0x2   :  { %14 = vsyncpa [#allocation9], 0 }
   0x3   :  { %15 = vsyncpa [#allocation4], 0  ;;  %s635_s24 = smov [#allocation5]  }
   0x4   :  { %s31_s25 = sshll.u32 %s635_s24, 4  ;;  %s32_s25 = int_to_ptr.vmem [resolvable:$true] %s31_s25 }
   0x5   :  { %s535_s26 = scalar_lea.vmem %s32_s25, 256  ;;  %p540_p1 = scmp.lt.s32.totalorder %s32_s25, %s32_s25 }
   0x6   :  { %p536_p0 = scmp.ne.s32.totalorder %s32_s25, %s535_s26  ;;  %p541_p2 = scmp.lt.s32.totalorder %s535_s26, %s535_s26 }
   0x8   :  { %p542_p3 = por %p541_p2, %p540_p1 }
   0xa   :  { %p543_p4 = pnand %p542_p3, %p536_p0 }
   0xc   :  { %546 = shalt.err (!%p543_p4)
}
   0xd   :  { %s636_s27 = smov 64   ;;  %s637_s28 = smov 4  }
   0xe   :  { %37 = dma.hbm_to_vmem [thread:$0]  %s742_s1, 256, %s32_s25, [#allocation6], %s636_s27, %s636_s27, %s637_s28  }
   0xf   :  { %s638_s8 = smov [#allocation2]   ;;  %s639_s10 = smov [#allocation7]  }
  0x10   :  { %s22_s9 = sshll.u32 %s638_s8, 4  ;;  %s45_s11 = sshll.u32 %s639_s10, 4  ;;  %s23_s9 = int_to_ptr.vmem [resolvable:$true] %s22_s9  ;;  %s46_s11 = int_to_ptr.vmem [resolvable:$true] %s45_s11 }
  0x11   :  { %s555_s12 = scalar_lea.vmem %s23_s9, 128  ;;  %p560_p6 = scmp.lt.s32.totalorder %s23_s9, %s23_s9 }
  0x12   :  { %p556_p5 = scmp.ne.s32.totalorder %s23_s9, %s555_s12  ;;  %p561_p7 = scmp.lt.s32.totalorder %s555_s12, %s555_s12 }
  0x14   :  { %p562_p8 = por %p561_p7, %p560_p6 }
  0x16   :  { %p563_p9 = pnand %p562_p8, %p556_p5 }
  0x18   :  { %566 = shalt.err (!%p563_p9)
}
  0x19   :  { %25 = dma.hbm_to_vmem [thread:$0]  %s741_s0, 128, %s23_s9, [#allocation3]  }
  0x1a   :  { %s575_s15 = scalar_lea.vmem %s46_s11, 1024  ;;  %p580_p11 = scmp.lt.s32.totalorder %s46_s11, %s46_s11 }
  0x1b   :  { %p576_p10 = scmp.ne.s32.totalorder %s46_s11, %s575_s15  ;;  %p581_p12 = scmp.lt.s32.totalorder %s575_s15, %s575_s15 }
  0x1d   :  { %p582_p13 = por %p581_p12, %p580_p11 }
  0x1f   :  { %p583_p0 = pnand %p582_p13, %p576_p10 }
  0x21   :  { %586 = shalt.err (!%p583_p0)
}
  0x22   :  { %51 = dma.hbm_to_vmem [thread:$0]  %s744_s3, 1024, %s46_s11, [#allocation6], %s636_s27, %s636_s27, %s637_s28  }
  0x23   :  { %s640_s17 = smov [#allocation8]  }
  0x24   :  { %s59_s18 = sshll.u32 %s640_s17, 4  ;;  %s60_s18 = int_to_ptr.vmem [resolvable:$true] %s59_s18 }
  0x25   :  { %s595_s19 = scalar_lea.vmem %s60_s18, 1024  ;;  %p600_p2 = scmp.lt.s32.totalorder %s60_s18, %s60_s18 }
  0x26   :  { %p596_p1 = scmp.ne.s32.totalorder %s60_s18, %s595_s19  ;;  %p601_p3 = scmp.lt.s32.totalorder %s595_s19, %s595_s19 }
  0x28   :  { %p602_p4 = por %p601_p3, %p600_p2 }
  0x2a   :  { %p603_p5 = pnand %p602_p4, %p596_p1 }
  0x2c   :  { %606 = shalt.err (!%p603_p5)
}
  0x2d   :  { %65 = dma.hbm_to_vmem [thread:$0]  %s746_s5, 1024, %s60_s18, [#allocation9], %s636_s27, %s636_s27, %s637_s28  }
  0x2e   :  { %627 = dma.done.wait [#allocation3], 128  }
  0x2f   :  { %628 = vsyncadd [#allocation3], 4294967168 }
  0x30   :  { %629 = dma.done.wait [#allocation6], 1280  }
  0x31   :  { %630 = vsyncadd [#allocation6], 4294966016 }
  0x32   :  { %631 = dma.done.wait [#allocation9], 1024  }
  0x33   :  { %632 = vsyncadd [#allocation9], 4294966272  ;;  %v641_v0 = vmov 0.0   ;;  %vm642_vm0 = vmmov 0   ;;  %v505_v1 = vld [vmem:[#allocation5 + $0x8] sm:$0xff]   ;;  %v506_v2 = vld [vmem:[#allocation5] sm:$0xff]  }
  0x34   :  { %448 = vmatprep.subr.bf16.mxu0 %v641_v0  ;;  %452 = vmatprep.mubr.msk.bf16.mxu0 %vm642_vm0, %v641_v0  ;;  %v81_v3 = vld [vmem:[#allocation2] sm:$0xff]  ;;  %v507_v4 = vld [vmem:[#allocation7 + $0x38] sm:$0xff]   ;;  %v508_v6 = vld [vmem:[#allocation7 + $0x30] sm:$0xff]   ;;  %vm106_vm1 = vcmask 261120   ;;  %vm386_vm2 = vcmask 130048  }
  0x35   :  { %456 = vmatprep.subr.bf16.mxu1 %v641_v0  ;;  %472 = vmatprep.mubr.msk.bf16.mxu1 %vm642_vm0, %v641_v0  ;;  %v82_v5 = vpack.c.bf16 %v81_v3, %v81_v3  ;;  %v509_v7 = vld [vmem:[#allocation7 + $0x28] sm:$0xff]   ;;  %v510_v8 = vld [vmem:[#allocation7 + $0x20] sm:$0xff]   ;;  %v511_v9 = vld [vmem:[#allocation7 + $0x18] sm:$0xff]  }
  0x36   :  { %449 = vmatpush3.bf16.msra.mxu0 %v505_v1  ;;  %457 = vmatpush3.bf16.msra.mxu1 %v507_v4  ;;  %v512_v10 = vld [vmem:[#allocation7 + $0x10] sm:$0xff]   ;;  %v513_v11 = vld [vmem:[#allocation7 + $0x8] sm:$0xff]   ;;  %v514_v12 = vld [vmem:[#allocation7] sm:$0xff]  }
  0x37   :  { %450 = vmatprep.subr.bf16.mxu0 %v641_v0  ;;  %458 = vmatprep.subr.bf16.mxu1 %v641_v0  ;;  %v515_v13 = vld [vmem:[#allocation8 + $0x38] sm:$0xff]   ;;  %v516_v14 = vld [vmem:[#allocation8 + $0x30] sm:$0xff]   ;;  %v517_v15 = vld [vmem:[#allocation8 + $0x28] sm:$0xff]  }
  0x38   :  { %v518_v16 = vld [vmem:[#allocation8 + $0x20] sm:$0xff]   ;;  %v519_v17 = vld [vmem:[#allocation8 + $0x18] sm:$0xff]   ;;  %v520_v18 = vld [vmem:[#allocation8 + $0x10] sm:$0xff]  }
  0x39   :  { %v405_v19 = vld [vmem:[%s743_s2] ss:$0 sm:$0xff]  ;;  %v522_v28 = vld [vmem:[#allocation8] sm:$0xff]  }
  0x3a   :  { %451 = vmatpush3.bf16.msra.mxu0 %v506_v2  ;;  %459 = vmatpush3.bf16.msra.mxu1 %v508_v6  ;;  %v521_v27 = vld [vmem:[#allocation8 + $0x8] sm:$0xff]  }
  0x3b   :  { %476 = vmatprep.subr.bf16.mxu0 %v641_v0  ;;  %460 = vmatprep.subr.bf16.mxu1 %v641_v0  ;;  %v409_v29 = vld [vmem:[%s745_s4] ss:$0 sm:$0xff]  ;;  %s643_s4 = smov [#allocation10]  }
  0x3c   :  { %v418_v37 = vld [vmem:[%s747_s6] ss:$0 sm:$0xff]  ;;  %s394_s24 = sshll.u32 %s643_s4, 4  ;;  %s395_s24 = int_to_ptr.vmem [resolvable:$true] %s394_s24 }
  0x3d   :  { %453 = vmatmul.mubr.msk.bf16.vlgmr.msra.gmra.mxu0 %vm106_vm1, %v82_v5  ;;  %s607_s6 = scalar_lea.vmem %s395_s24, 128  ;;  %p612_p7 = scmp.lt.s32.totalorder %s395_s24, %s395_s24 }
  0x3e   :  { %492 = vmatprep.mubr.msk.bf16.mxu0 %vm642_vm0, %v641_v0  ;;  %461 = vmatpush3.bf16.msra.mxu1 %v509_v7  ;;  %p608_p6 = scmp.ne.s32.totalorder %s395_s24, %s607_s6  ;;  %p613_p8 = scmp.lt.s32.totalorder %s607_s6, %s607_s6 }
  0x3f   :  { %462 = vmatprep.subr.bf16.mxu1 %v641_v0  ;;  %477 = vmatpush3.bf16.msra.mxu0 %v515_v13 }
  0x40   :  { %478 = vmatprep.subr.bf16.mxu0 %v641_v0  ;;  %p614_p9 = por %p613_p8, %p612_p7 }
  0x42   :  { %463 = vmatpush3.bf16.msra.mxu1 %v510_v8  ;;  %p615_p10 = pnand %p614_p9, %p608_p6 }
  0x43   :  { %464 = vmatprep.subr.bf16.mxu1 %v641_v0  ;;  %479 = vmatpush3.bf16.msra.mxu0 %v516_v14 }
  0x44   :  { %480 = vmatprep.subr.bf16.mxu0 %v641_v0 }
  0x46   :  { %465 = vmatpush3.bf16.msra.mxu1 %v511_v9 }
  0x47   :  { %466 = vmatprep.subr.bf16.mxu1 %v641_v0  ;;  %481 = vmatpush3.bf16.msra.mxu0 %v517_v15 }
  0x48   :  { %482 = vmatprep.subr.bf16.mxu0 %v641_v0 }
  0x4a   :  { %467 = vmatpush3.bf16.msra.mxu1 %v512_v10 }
  0x4b   :  { %468 = vmatprep.subr.bf16.mxu1 %v641_v0  ;;  %483 = vmatpush3.bf16.msra.mxu0 %v518_v16 }
  0x4c   :  { %484 = vmatprep.subr.bf16.mxu0 %v641_v0 }
  0x4e   :  { %469 = vmatpush3.bf16.msra.mxu1 %v513_v11 }
  0x4f   :  { %470 = vmatprep.subr.bf16.mxu1 %v641_v0  ;;  %485 = vmatpush3.bf16.msra.mxu0 %v519_v17 }
  0x50   :  { %486 = vmatprep.subr.bf16.mxu0 %v641_v0 }
  0x52   :  { %471 = vmatpush3.bf16.msra.mxu1 %v514_v12 }
  0x53   :  { %487 = vmatpush3.bf16.msra.mxu0 %v520_v18 }
  0x54   :  { %488 = vmatprep.subr.bf16.mxu0 %v641_v0 }
  0x57   :  { %489 = vmatpush3.bf16.msra.mxu0 %v521_v27 }
  0x58   :  { %490 = vmatprep.subr.bf16.mxu0 %v641_v0 }
  0x5b   :  { %491 = vmatpush3.bf16.msra.mxu0 %v522_v28 }
  0xfd   :  { %v144_v20 = vpop.f32.mrf.mxu0 }
  0xfe   :  { %v145_v21 = vadd.f32 %v405_v19, %v144_v20 }
  0xff   :  { %v454_v22 = vpop.f32.mrf.mxu0 }
 0x100   :  { %v150_v23 = vmax.f32 %v145_v21, 0.0 }
 0x101   :  { %v147_v24 = vpop.f32.mrf.mxu0 }
 0x102   :  { %v151_v25 = vpack.c.bf16 %v150_v23, %v150_v23 }
 0x103   :  { %v455_v26 = vpop.f32.mrf.mxu0 }
 0x104   :  { %473 = vmatmul.mubr.bf16.vlgmr.msra.gmra.mxu1 %v151_v25 }
 0x1c4   :  { %v257_v30 = vpop.f32.mrf.mxu1 }
 0x1c5   :  { %v258_v31 = vadd.f32 %v409_v29, %v257_v30 }
 0x1c6   :  { %v474_v32 = vpop.f32.mrf.mxu1 }
 0x1c7   :  { %v263_v33 = vmax.f32 %v258_v31, 0.0 }
 0x1c8   :  { %v260_v34 = vpop.f32.mrf.mxu1 }
 0x1c9   :  { %v264_v35 = vpack.c.bf16 %v263_v33, %v263_v33 }
 0x1ca   :  { %v475_v36 = vpop.f32.mrf.mxu1 }
 0x1cb   :  { %493 = vmatmul.mubr.bf16.vlgmr.msra.gmra.mxu0 %v264_v35 }
 0x28b   :  { %v370_v38 = vpop.f32.mrf.mxu0 }
 0x28c   :  { %v371_v39 = vadd.f32 %v418_v37, %v370_v38 }
 0x28d   :  { %v494_v40 = vpop.f32.mrf.mxu0 }
 0x28e   :  { %376 = vmax.xlane.f32.xlu0 %v371_v39 }
 0x28f   :  { %v373_v41 = vpop.f32.mrf.mxu0 }
 0x291   :  { %v495_v42 = vpop.f32.mrf.mxu0 }
 0x317   :  { %v377_v43 = vpop.xlane.xlu0 %376 }
 0x318   :  { %v378_v44 = vsub.f32 %v371_v39, %v377_v43 }
 0x31a   :  { %v379_v45 = vmul.f32 1.442695, %v378_v44 }
 0x31c   :  { %523 = vpow2.f32 %v379_v45 }
 0x329   :  { %v524_v46 = vpop.eup %523 }
 0x32a   :  { %381 = vadd.xlane.f32.xlu0 %v524_v46 }
 0x3b3   :  { %v382_v47 = vpop.xlane.xlu0 %381 }
 0x3b4   :  { %525 = vlog2.f32 %v382_v47 }
 0x3c1   :  { %v526_v48 = vpop.eup %525 }
 0x3c2   :  { %v384_v49 = vmul.f32 0.6931472, %v526_v48 }
 0x3c4   :  { %v385_v50 = vsub.f32 %v378_v44, %v384_v49 }
 0x3c6   :  { %387 = vst.msk [vmem:[#allocation10] sm:$0xff] %vm386_vm2, %v385_v50 }
 0x3c7   :  { %618 = shalt.err (!%p615_p10)
}
 0x3c8   :  { %397 = dma.vmem_to_hbm [thread:$0]  %s395_s24, 128, %s748_s7, [#allocation4]  }
 0x3c9   :  { %633 = dma.done.wait [#allocation4], 128  }
 0x3ca   :  { %634 = vsyncadd [#allocation4], 4294967168 }
 0x3cb   :  { %401 = vsyncpa [#allocation3], 1 }
 0x3cc   :  { %402 = vsyncpa [#allocation6], 1 }
 0x3cd   :  { %403 = vsyncpa [#allocation9], 1 }
 0x3ce   :  { %404 = vsyncpa [#allocation4], 1 }

</bundles_post_ra>
